<compile_context>
chip_gen: v5e
topology: v5e:2x2
jax: 0.10.0
libtpu: 0.0.40
codegen_flags: <defaults>
</compile_context>

<pallas_src>
import jax
import jax.numpy as jnp
from jax.experimental import pallas as pl
from jax.experimental.pallas import tpu as pltpu


# --------------------------------------------------------------------------
# Tiling helpers
# --------------------------------------------------------------------------
_VMEM_LIMIT_BYTES = 48 * 1024 * 1024     # safe on v5e/v6e (128 MiB) and v7x (64 MiB)
_TARGET_TILE_BYTES = 8 * 1024 * 1024     # per hidden tile (double-buffered -> 16 MiB)


def _seq_tiling(B, S, H, itemsize, target_bytes=_TARGET_TILE_BYTES):
    """Pick (seq_tile, num_tiles) with no host-side padding of the array.

    - small S: one full tile (TS == S, block equals full dims -> always legal)
    - large S: TS is a multiple of 128 (legal for both the 3-D hidden blocks
      and the 2-D (B, TS) mask blocks); the ragged tail block is masked
      in-kernel, never padded in HBM.
    """
    per_token = max(1, B * H * itemsize)
    ts = target_bytes // per_token
    if ts >= S:
        return S, 1
    ts = max(128, (ts // 128) * 128)
    return ts, pl.cdiv(S, ts)


# --------------------------------------------------------------------------
# Kernel 1 (inference path): logit for the LAST token only.
#   logit = attn_mask[:, -1] * (h_last @ w) + b          (B,) scalars
# --------------------------------------------------------------------------
def last_token_logits_pallas(h_last, m_last, w_hk, b):
    B, H = h_last.shape

    def kernel(h_ref, m_ref, w_ref, b_ref, o_ref):
        # (B, H) bf16 x (H, 1) bf16 -> (B, 1) f32 on the MXU
        x = jax.lax.dot_general(h_ref[...], w_ref[...],
                                (((1,), (0,)), ((), ())),
                                preferred_element_type=jnp.float32)
        o_ref[...] = m_ref[...] * x + b_ref[0]

    out = pl.pallas_call(
        kernel,
        out_shape=jax.ShapeDtypeStruct((B, 1), jnp.float32),
        in_specs=[
            pl.BlockSpec(memory_space=pltpu.MemorySpace.VMEM),   # h_last (B, H)
            pl.BlockSpec(memory_space=pltpu.MemorySpace.VMEM),   # mask   (B, 1)
            pl.BlockSpec(memory_space=pltpu.MemorySpace.VMEM),   # weight (H, 1)
            pl.BlockSpec(memory_space=pltpu.MemorySpace.SMEM),   # bias   (1,)
        ],
        out_specs=pl.BlockSpec(memory_space=pltpu.MemorySpace.VMEM),
        compiler_params=pltpu.CompilerParams(vmem_limit_bytes=_VMEM_LIMIT_BYTES),
    )(h_last, m_last, w_hk, b)
    return out[:, 0]


# --------------------------------------------------------------------------
# Kernel 2 (training path): fused classifier + masked BCE-with-logits loss,
# accuracy numerator and mask count.  Grid = (2, seq_tiles_per_half); the
# leading "parallel" axis engages both TensorCores on v7x, each half keeps
# its own (1,1,1) accumulator row; partials are combined in JAX.
# --------------------------------------------------------------------------
def fused_loss_pallas(hidden, attention_mask, labels,
                      prefix_lengths, text_lengths, w_hk, b):
    B, S, H = hidden.shape
    TS, nt = _seq_tiling(B, S, H, hidden.dtype.itemsize)
    P = 2                                # dual-TC split on v7x; harmless elsewhere
    nth = pl.cdiv(nt, P)

    labels2d = labels.astype(jnp.float32).reshape(B, 1)
    prefix2d = prefix_lengths.astype(jnp.int32).reshape(B, 1)
    text2d = text_lengths.astype(jnp.int32).reshape(B, 1)

    def kernel(hid_ref, attn_ref, lab_ref, pre_ref, txt_ref, w_ref, b_ref,
               loss_ref, acc_ref, n_ref):
        i = pl.program_id(1)

        @pl.when(i == 0)
        def _init():
            loss_ref[...] = jnp.zeros_like(loss_ref)
            acc_ref[...] = jnp.zeros_like(acc_ref)
            n_ref[...] = jnp.zeros_like(n_ref)

        # global sequence-tile index (may run past nt; masked to zero below)
        t = pl.program_id(0) * pl.num_programs(1) + i

        h = hid_ref[...]                                          # (B, TS, H) bf16
        # H-contraction on the MXU: bf16 x bf16 -> f32, no f32 widen of the tile
        x = jax.lax.dot_general(h.reshape(B * TS, H), w_ref[...],
                                (((1,), (0,)), ((), ())),
                                preferred_element_type=jnp.float32).reshape(B, TS)
        # fold the backbone's attention-mask multiply + classifier bias
        x = attn_ref[...].astype(jnp.float32) * x + b_ref[0]      # logits (B, TS)

        # loss mask built in-kernel: prefix_len <= pos < text_len (< S guards
        # the ragged tail block AND the clamped out-of-range tiles of the
        # parallel split -> those contribute exactly zero)
        pos = t * TS + jax.lax.broadcasted_iota(jnp.int32, (B, TS), 1)
        valid = (pos >= pre_ref[...]) & (pos < txt_ref[...]) & (pos < S)

        y = jnp.broadcast_to(lab_ref[...], (B, TS))               # labels in {0,1}
        # numerically-stable BCE with logits (== torch BCEWithLogitsLoss, summed)
        per_elem = jnp.maximum(x, 0.0) - x * y + jnp.log1p(jnp.exp(-jnp.abs(x)))
        # NOTE: reference thresholds the *raw logits* at 0.5 (not sigmoid)
        correct = ((x >= 0.5) == (y >= 0.5)).astype(jnp.float32)

        vf = valid.astype(jnp.float32)
        # jnp.where (not multiply) so NaN/Inf from garbage tail reads can't leak
        loss_ref[...] += jnp.sum(jnp.where(valid, per_elem, 0.0))
        acc_ref[...] += jnp.sum(correct * vf)
        n_ref[...] += jnp.sum(vf)

    def hid_map(p, i):
        return (0, jnp.minimum(p * nth + i, nt - 1), 0)

    def tile2d_map(p, i):
        return (0, jnp.minimum(p * nth + i, nt - 1))

    acc_spec = pl.BlockSpec((1, 1, 1), lambda p, i: (p, 0, 0))
    acc_shape = jax.ShapeDtypeStruct((P, 1, 1), jnp.float32)

    loss_s, acc_s, n_s = pl.pallas_call(
        kernel,
        out_shape=(acc_shape, acc_shape, acc_shape),
        grid=(P, nth),
        in_specs=[
            pl.BlockSpec((B, TS, H), hid_map),                    # hidden tile stream
            pl.BlockSpec((B, TS), tile2d_map),                    # attention mask tile
            pl.BlockSpec((B, 1), lambda p, i: (0, 0)),            # labels (resident)
            pl.BlockSpec((B, 1), lambda p, i: (0, 0)),            # prefix_lengths
            pl.BlockSpec((B, 1), lambda p, i: (0, 0)),            # text_lengths
            pl.BlockSpec((H, 1), lambda p, i: (0, 0)),            # classifier weight
            pl.BlockSpec(memory_space=pltpu.MemorySpace.SMEM),    # bias (1,)
        ],
        out_specs=(acc_spec, acc_spec, acc_spec),
        compiler_params=pltpu.CompilerParams(
            dimension_semantics=("parallel", "arbitrary"),
            vmem_limit_bytes=_VMEM_LIMIT_BYTES,
        ),
    )(hidden, attention_mask, labels2d, prefix2d, text2d, w_hk, b)

    loss_sum = jnp.sum(loss_s)
    acc_sum = jnp.sum(acc_s)
    n_sum = jnp.sum(n_s)
    # guard against an all-empty mask (PyTorch would produce NaN here)
    denom = jnp.maximum(n_sum, 1.0)
    return loss_sum / denom, acc_sum / denom, n_sum.astype(jnp.int32)


# --------------------------------------------------------------------------
# Plain-JAX glue: synthetic backbone + module wrapper
# --------------------------------------------------------------------------
class CommandAlignmentClassifierPallas:
    def __init__(self, vocab_size, hidden_size, key):
        k_emb, k_w, k_b = jax.random.split(key, 3)
        # synthetic deterministic parameters; hidden stream stored in bf16 to
        # halve HBM traffic
        self.embedding = (jax.random.normal(k_emb, (vocab_size, hidden_size),
                                            jnp.float32) * 0.02).astype(jnp.bfloat16)
        # classifier = nn.Linear(hidden_size, 1): weight (1, H) f32, bias (1,) f32
        self.cls_w = jax.random.normal(k_w, (1, hidden_size), jnp.float32) * 0.02
        self.cls_b = jax.random.normal(k_b, (1,), jnp.float32) * 0.02
        # bf16 (H, 1) copy used by the kernels (MXU bf16 x bf16 contraction)
        self.cls_w_hk = self.cls_w.T.astype(jnp.bfloat16)
        self.hidden_size = hidden_size

    def _backbone(self, input_ids):
        # TODO(synk): stand-in for AutoModel(...)'s last_hidden_state; the
        # attention-mask multiply of the synthetic backbone is folded into the
        # Pallas kernels (mask * dot(h, w) + b) instead of a separate HBM pass.
        return jnp.take(self.embedding, input_ids, axis=0)        # (B, S, H) bf16

    def forward(self, input_ids, attention_mask,
                prefix_lengths=None, text_lengths=None, labels=None):
        # Dropout is identity at eval time.
        if labels is None:
            # Inference: only logits[:, -1] is needed -> embed/classify just
            # the last token ((B, H) instead of streaming (B, S, H)).
            h_last = jnp.take(self.embedding, input_ids[:, -1], axis=0)   # (B, H)
            m_last = attention_mask[:, -1:].astype(jnp.float32)           # (B, 1)
            return last_token_logits_pallas(h_last, m_last, self.cls_w_hk, self.cls_b)

        hidden = self._backbone(input_ids)                                # (B, S, H)
        return fused_loss_pallas(hidden, attention_mask, labels,
                                 prefix_lengths, text_lengths,
                                 self.cls_w_hk, self.cls_b)


# --------------------------------------------------------------------------
if __name__ == "__main__":
    B, S, H, VOCAB = 2, 8, 32, 50

    key = jax.random.PRNGKey(0)
    k_model, k_ids = jax.random.split(key)

    model = CommandAlignmentClassifierPallas(VOCAB, H, k_model)

    input_ids = jax.random.randint(k_ids, (B, S), 0, VOCAB, dtype=jnp.int32)
    text_lengths = jnp.array([6, 8], dtype=jnp.int32)
    prefix_lengths = jnp.array([2, 3], dtype=jnp.int32)
    attention_mask = (jnp.arange(S)[None, :] < text_lengths[:, None]).astype(jnp.int32)
    labels = jnp.array([0, 1], dtype=jnp.int32)

    # training path: (loss, acc, n)
    loss, acc, n = model.forward(input_ids, attention_mask,
                                 prefix_lengths=prefix_lengths,
                                 text_lengths=text_lengths,
                                 labels=labels)
    jax.block_until_ready((loss, acc, n))

    # inference path: logits[:, -1]
    last_logits = model.forward(input_ids, attention_mask)
    jax.block_until_ready(last_logits)

    print("KERNEL_OK")
</pallas_src>

<mosaic_0001>
module attributes {stable_mosaic.version = 11 : i64} {
  func.func @kernel(%arg0: i32, %arg1: i32, %arg2: memref<2x8x32xbf16, #tpu.memory_space<vmem>>, %arg3: memref<2x8xi32, #tpu.memory_space<vmem>>, %arg4: memref<2x1xf32, #tpu.memory_space<vmem>>, %arg5: memref<2x1xi32, #tpu.memory_space<vmem>>, %arg6: memref<2x1xi32, #tpu.memory_space<vmem>>, %arg7: memref<32x1xbf16, #tpu.memory_space<vmem>>, %arg8: memref<1xf32, #tpu.memory_space<smem>>, %arg9: memref<1x1x1xf32, #tpu.memory_space<vmem>>, %arg10: memref<1x1x1xf32, #tpu.memory_space<vmem>>, %arg11: memref<1x1x1xf32, #tpu.memory_space<vmem>>) attributes {dimension_semantics = [#tpu.dimension_semantics<parallel>, #tpu.dimension_semantics<arbitrary>], iteration_bounds = array<i64: 2, 1>, scalar_prefetch = 0 : i64, scratch_operands = 0 : i64, tpu.core_type = #tpu.core_type<tc>, window_params = [{transform_indices = @transform_0, window_bounds = array<i64: 2, 8, 32>}, {transform_indices = @transform_1, window_bounds = array<i64: 2, 8>}, {pipeline_mode = #tpu.pipeline_mode<synchronous>, transform_indices = @transform_2, window_bounds = array<i64: 2, 1>}, {pipeline_mode = #tpu.pipeline_mode<synchronous>, transform_indices = @transform_3, window_bounds = array<i64: 2, 1>}, {pipeline_mode = #tpu.pipeline_mode<synchronous>, transform_indices = @transform_4, window_bounds = array<i64: 2, 1>}, {pipeline_mode = #tpu.pipeline_mode<synchronous>, transform_indices = @transform_5, window_bounds = array<i64: 32, 1>}, {transform_indices = @transform_6, window_bounds = array<i64: 1>}, {transform_indices = @transform_7, window_bounds = array<i64: 1, 1, 1>}, {transform_indices = @transform_8, window_bounds = array<i64: 1, 1, 1>}, {transform_indices = @transform_9, window_bounds = array<i64: 1, 1, 1>}]} {
    %c0_i32 = arith.constant 0 : i32
    %0 = arith.cmpi eq, %arg1, %c0_i32 : i32
    %1 = arith.extui %0 : i1 to i32
    %c0_i32_0 = arith.constant 0 : i32
    %2 = arith.cmpi ne, %1, %c0_i32_0 : i32
    scf.if %2 {
      %cst_42 = arith.constant 0.000000e+00 : f32
      %80 = vector.broadcast %cst_42 : f32 to vector<1x1x1xf32>
      %c0_43 = arith.constant 0 : index
      %c0_44 = arith.constant 0 : index
      %c0_45 = arith.constant 0 : index
      %81 = vector.load %arg9[%c0_43, %c0_44, %c0_45] : memref<1x1x1xf32, #tpu.memory_space<vmem>>, vector<1x1x1xf32>
      tpu.vector_store %arg9[%c0_43, %c0_44, %c0_45], %80 {strides = array<i32>} : memref<1x1x1xf32, #tpu.memory_space<vmem>>, vector<1x1x1xf32>,
      %cst_46 = arith.constant 0.000000e+00 : f32
      %82 = vector.broadcast %cst_46 : f32 to vector<1x1x1xf32>
      %c0_47 = arith.constant 0 : index
      %c0_48 = arith.constant 0 : index
      %c0_49 = arith.constant 0 : index
      %83 = vector.load %arg10[%c0_47, %c0_48, %c0_49] : memref<1x1x1xf32, #tpu.memory_space<vmem>>, vector<1x1x1xf32>
      tpu.vector_store %arg10[%c0_47, %c0_48, %c0_49], %82 {strides = array<i32>} : memref<1x1x1xf32, #tpu.memory_space<vmem>>, vector<1x1x1xf32>,
      %cst_50 = arith.constant 0.000000e+00 : f32
      %84 = vector.broadcast %cst_50 : f32 to vector<1x1x1xf32>
      %c0_51 = arith.constant 0 : index
      %c0_52 = arith.constant 0 : index
      %c0_53 = arith.constant 0 : index
      %85 = vector.load %arg11[%c0_51, %c0_52, %c0_53] : memref<1x1x1xf32, #tpu.memory_space<vmem>>, vector<1x1x1xf32>
      tpu.vector_store %arg11[%c0_51, %c0_52, %c0_53], %84 {strides = array<i32>} : memref<1x1x1xf32, #tpu.memory_space<vmem>>, vector<1x1x1xf32>,
    } else {
    }
    %c1_i32 = arith.constant 1 : i32
    %3 = arith.muli %arg0, %c1_i32 : i32
    %4 = arith.addi %3, %arg1 : i32
    %c0 = arith.constant 0 : index
    %c0_1 = arith.constant 0 : index
    %c0_2 = arith.constant 0 : index
    %5 = vector.load %arg2[%c0, %c0_1, %c0_2] : memref<2x8x32xbf16, #tpu.memory_space<vmem>>, vector<2x8x32xbf16>
    %6 = vector.shape_cast %5 : vector<2x8x32xbf16> to vector<16x32xbf16>
    %c0_3 = arith.constant 0 : index
    %c0_4 = arith.constant 0 : index
    %7 = vector.load %arg7[%c0_3, %c0_4] : memref<32x1xbf16, #tpu.memory_space<vmem>>, vector<32x1xbf16>
    %cst = arith.constant dense<0.000000e+00> : vector<16x1xf32>
    %8 = tpu.matmul %6, %7, %cst {dimension_numbers = #tpu.dot_dimension_numbers<[1], [0], [0], [1], [0, 0, 1, 1], [], []>} : vector<16x32xbf16>, vector<32x1xbf16>, vector<16x1xf32> -> vector<16x1xf32>
    %9 = vector.shape_cast %8 : vector<16x1xf32> to vector<2x8xf32>
    %c0_5 = arith.constant 0 : index
    %c0_6 = arith.constant 0 : index
    %10 = vector.load %arg3[%c0_5, %c0_6] : memref<2x8xi32, #tpu.memory_space<vmem>>, vector<2x8xi32>
    %11 = arith.sitofp %10 : vector<2x8xi32> to vector<2x8xf32>
    %12 = arith.mulf %11, %9 : vector<2x8xf32>
    %c0_7 = arith.constant 0 : index
    %13 = memref.load %arg8[%c0_7] : memref<1xf32, #tpu.memory_space<smem>>
    %14 = vector.broadcast %13 : f32 to vector<2x8xf32>
    %15 = arith.addf %12, %14 : vector<2x8xf32>
    %c8_i32 = arith.constant 8 : i32
    %16 = arith.muli %4, %c8_i32 : i32
    %17 = tpu.iota {dimensions = array<i32: 1>} : vector<2x8xi32>
    %18 = vector.broadcast %16 : i32 to vector<2x8xi32>
    %19 = arith.addi %18, %17 : vector<2x8xi32>
    %c0_8 = arith.constant 0 : index
    %c0_9 = arith.constant 0 : index
    %20 = vector.load %arg5[%c0_8, %c0_9] : memref<2x1xi32, #tpu.memory_space<vmem>>, vector<2x1xi32>
    %21 = vector.broadcast %20 : vector<2x1xi32> to vector<2x8xi32>
    %22 = arith.cmpi sge, %19, %21 : vector<2x8xi32>
    %c0_10 = arith.constant 0 : index
    %c0_11 = arith.constant 0 : index
    %23 = vector.load %arg6[%c0_10, %c0_11] : memref<2x1xi32, #tpu.memory_space<vmem>>, vector<2x1xi32>
    %24 = vector.broadcast %23 : vector<2x1xi32> to vector<2x8xi32>
    %25 = arith.cmpi slt, %19, %24 : vector<2x8xi32>
    %26 = arith.andi %22, %25 : vector<2x8xi1>
    %c8_i32_12 = arith.constant 8 : i32
    %27 = vector.broadcast %c8_i32_12 : i32 to vector<2x8xi32>
    %28 = arith.cmpi slt, %19, %27 : vector<2x8xi32>
    %29 = arith.andi %26, %28 : vector<2x8xi1>
    %c0_13 = arith.constant 0 : index
    %c0_14 = arith.constant 0 : index
    %30 = vector.load %arg4[%c0_13, %c0_14] : memref<2x1xf32, #tpu.memory_space<vmem>>, vector<2x1xf32>
    %31 = vector.shape_cast %30 : vector<2x1xf32> to vector<2x1xf32>
    %32 = vector.broadcast %31 : vector<2x1xf32> to vector<2x8xf32>
    %cst_15 = arith.constant 0.000000e+00 : f32
    %33 = vector.broadcast %cst_15 : f32 to vector<2x8xf32>
    %34 = arith.maximumf %15, %33 : vector<2x8xf32>
    %35 = arith.mulf %15, %32 : vector<2x8xf32>
    %36 = arith.subf %34, %35 : vector<2x8xf32>
    %37 = math.absf %15 : vector<2x8xf32>
    %cst_16 = arith.constant 0.000000e+00 : f32
    %38 = vector.broadcast %cst_16 : f32 to vector<2x8xf32>
    %39 = arith.subf %38, %37 : vector<2x8xf32>
    %40 = math.exp %39 : vector<2x8xf32>
    %41 = math.log1p %40 : vector<2x8xf32>
    %42 = arith.addf %36, %41 : vector<2x8xf32>
    %cst_17 = arith.constant 5.000000e-01 : f32
    %43 = vector.broadcast %cst_17 : f32 to vector<2x8xf32>
    %44 = arith.cmpf oge, %15, %43 : vector<2x8xf32>
    %cst_18 = arith.constant 5.000000e-01 : f32
    %45 = vector.broadcast %cst_18 : f32 to vector<2x8xf32>
    %46 = arith.cmpf oge, %32, %45 : vector<2x8xf32>
    %47 = arith.xori %44, %46 : vector<2x8xi1>
    %cst_19 = arith.constant dense<true> : vector<2x8xi1>
    %48 = arith.xori %47, %cst_19 : vector<2x8xi1>
    %49 = arith.extui %48 : vector<2x8xi1> to vector<2x8xi32>
    %50 = arith.sitofp %49 : vector<2x8xi32> to vector<2x8xf32>
    %51 = arith.extui %29 : vector<2x8xi1> to vector<2x8xi32>
    %52 = arith.sitofp %51 : vector<2x8xi32> to vector<2x8xf32>
    %c0_20 = arith.constant 0 : index
    %c0_21 = arith.constant 0 : index
    %c0_22 = arith.constant 0 : index
    %53 = vector.load %arg9[%c0_20, %c0_21, %c0_22] : memref<1x1x1xf32, #tpu.memory_space<vmem>>, vector<1x1x1xf32>
    %cst_23 = arith.constant 0.000000e+00 : f32
    %54 = vector.broadcast %cst_23 : f32 to vector<2x8xf32>
    %55 = arith.select %29, %42, %54 : vector<2x8xi1>, vector<2x8xf32>
    %56 = vector.shape_cast %55 : vector<2x8xf32> to vector<1x2x8xf32>
    %cst_24 = arith.constant dense<0.000000e+00> : vector<1xf32>
    %57 = vector.multi_reduction <add>, %56, %cst_24 [1, 2] : vector<1x2x8xf32> to vector<1xf32>
    %58 = vector.shape_cast %57 : vector<1xf32> to vector<1x1x1xf32>
    %59 = vector.extract %58[0, 0, 0] : f32 from vector<1x1x1xf32>
    %60 = vector.broadcast %59 : f32 to vector<1x1x1xf32>
    %61 = arith.addf %53, %60 : vector<1x1x1xf32>
    %c0_25 = arith.constant 0 : index
    %c0_26 = arith.constant 0 : index
    %c0_27 = arith.constant 0 : index
    %62 = vector.load %arg9[%c0_25, %c0_26, %c0_27] : memref<1x1x1xf32, #tpu.memory_space<vmem>>, vector<1x1x1xf32>
    tpu.vector_store %arg9[%c0_25, %c0_26, %c0_27], %61 {strides = array<i32>} : memref<1x1x1xf32, #tpu.memory_space<vmem>>, vector<1x1x1xf32>,
    %c0_28 = arith.constant 0 : index
    %c0_29 = arith.constant 0 : index
    %c0_30 = arith.constant 0 : index
    %63 = vector.load %arg10[%c0_28, %c0_29, %c0_30] : memref<1x1x1xf32, #tpu.memory_space<vmem>>, vector<1x1x1xf32>
    %64 = arith.mulf %50, %52 : vector<2x8xf32>
    %65 = vector.shape_cast %64 : vector<2x8xf32> to vector<1x2x8xf32>
    %cst_31 = arith.constant dense<0.000000e+00> : vector<1xf32>
    %66 = vector.multi_reduction <add>, %65, %cst_31 [1, 2] : vector<1x2x8xf32> to vector<1xf32>
    %67 = vector.shape_cast %66 : vector<1xf32> to vector<1x1x1xf32>
    %68 = vector.extract %67[0, 0, 0] : f32 from vector<1x1x1xf32>
    %69 = vector.broadcast %68 : f32 to vector<1x1x1xf32>
    %70 = arith.addf %63, %69 : vector<1x1x1xf32>
    %c0_32 = arith.constant 0 : index
    %c0_33 = arith.constant 0 : index
    %c0_34 = arith.constant 0 : index
    %71 = vector.load %arg10[%c0_32, %c0_33, %c0_34] : memref<1x1x1xf32, #tpu.memory_space<vmem>>, vector<1x1x1xf32>
    tpu.vector_store %arg10[%c0_32, %c0_33, %c0_34], %70 {strides = array<i32>} : memref<1x1x1xf32, #tpu.memory_space<vmem>>, vector<1x1x1xf32>,
    %c0_35 = arith.constant 0 : index
    %c0_36 = arith.constant 0 : index
    %c0_37 = arith.constant 0 : index
    %72 = vector.load %arg11[%c0_35, %c0_36, %c0_37] : memref<1x1x1xf32, #tpu.memory_space<vmem>>, vector<1x1x1xf32>
    %73 = vector.shape_cast %52 : vector<2x8xf32> to vector<1x2x8xf32>
    %cst_38 = arith.constant dense<0.000000e+00> : vector<1xf32>
    %74 = vector.multi_reduction <add>, %73, %cst_38 [1, 2] : vector<1x2x8xf32> to vector<1xf32>
    %75 = vector.shape_cast %74 : vector<1xf32> to vector<1x1x1xf32>
    %76 = vector.extract %75[0, 0, 0] : f32 from vector<1x1x1xf32>
    %77 = vector.broadcast %76 : f32 to vector<1x1x1xf32>
    %78 = arith.addf %72, %77 : vector<1x1x1xf32>
    %c0_39 = arith.constant 0 : index
    %c0_40 = arith.constant 0 : index
    %c0_41 = arith.constant 0 : index
    %79 = vector.load %arg11[%c0_39, %c0_40, %c0_41] : memref<1x1x1xf32, #tpu.memory_space<vmem>>, vector<1x1x1xf32>
    tpu.vector_store %arg11[%c0_39, %c0_40, %c0_41], %78 {strides = array<i32>} : memref<1x1x1xf32, #tpu.memory_space<vmem>>, vector<1x1x1xf32>,
    return
  }
  func.func @transform_0(%arg0: i32, %arg1: i32) -> (i32, i32, i32) {
    %c1_i32 = arith.constant 1 : i32
    %0 = arith.muli %arg0, %c1_i32 : i32
    %1 = arith.addi %0, %arg1 : i32
    %c0_i32 = arith.constant 0 : i32
    %2 = arith.minsi %1, %c0_i32 : i32
    %c0_i32_0 = arith.constant 0 : i32
    %c0_i32_1 = arith.constant 0 : i32
    %c0_i32_2 = arith.constant 0 : i32
    return %c0_i32_0, %2, %c0_i32_1 : i32, i32, i32
  }
  func.func @transform_1(%arg0: i32, %arg1: i32) -> (i32, i32) {
    %c1_i32 = arith.constant 1 : i32
    %0 = arith.muli %arg0, %c1_i32 : i32
    %1 = arith.addi %0, %arg1 : i32
    %c0_i32 = arith.constant 0 : i32
    %2 = arith.minsi %1, %c0_i32 : i32
    %c0_i32_0 = arith.constant 0 : i32
    %c0_i32_1 = arith.constant 0 : i32
    return %c0_i32_0, %2 : i32, i32
  }
  func.func @transform_2(%arg0: i32, %arg1: i32) -> (i32, i32) {
    %c0_i32 = arith.constant 0 : i32
    %c0_i32_0 = arith.constant 0 : i32
    %c0_i32_1 = arith.constant 0 : i32
    return %c0_i32, %c0_i32_0 : i32, i32
  }
  func.func @transform_3(%arg0: i32, %arg1: i32) -> (i32, i32) {
    %c0_i32 = arith.constant 0 : i32
    %c0_i32_0 = arith.constant 0 : i32
    %c0_i32_1 = arith.constant 0 : i32
    return %c0_i32, %c0_i32_0 : i32, i32
  }
  func.func @transform_4(%arg0: i32, %arg1: i32) -> (i32, i32) {
    %c0_i32 = arith.constant 0 : i32
    %c0_i32_0 = arith.constant 0 : i32
    %c0_i32_1 = arith.constant 0 : i32
    return %c0_i32, %c0_i32_0 : i32, i32
  }
  func.func @transform_5(%arg0: i32, %arg1: i32) -> (i32, i32) {
    %c0_i32 = arith.constant 0 : i32
    %c0_i32_0 = arith.constant 0 : i32
    %c0_i32_1 = arith.constant 0 : i32
    return %c0_i32, %c0_i32_0 : i32, i32
  }
  func.func @transform_6(%arg0: i32, %arg1: i32) -> i32 {
    %c0_i32 = arith.constant 0 : i32
    %c0_i32_0 = arith.constant 0 : i32
    return %c0_i32 : i32
  }
  func.func @transform_7(%arg0: i32, %arg1: i32) -> (i32, i32, i32) {
    %c0_i32 = arith.constant 0 : i32
    %c0_i32_0 = arith.constant 0 : i32
    %c0_i32_1 = arith.constant 0 : i32
    return %arg0, %c0_i32, %c0_i32_0 : i32, i32, i32
  }
  func.func @transform_8(%arg0: i32, %arg1: i32) -> (i32, i32, i32) {
    %c0_i32 = arith.constant 0 : i32
    %c0_i32_0 = arith.constant 0 : i32
    %c0_i32_1 = arith.constant 0 : i32
    return %arg0, %c0_i32, %c0_i32_0 : i32, i32, i32
  }
  func.func @transform_9(%arg0: i32, %arg1: i32) -> (i32, i32, i32) {
    %c0_i32 = arith.constant 0 : i32
    %c0_i32_0 = arith.constant 0 : i32
    %c0_i32_1 = arith.constant 0 : i32
    return %arg0, %c0_i32, %c0_i32_0 : i32, i32, i32
  }
}

</mosaic_0001>

<bundles_post_ra>
// kernel: tpu_custom_call.1
= control target key start
LH: loop header
LB: loop body
LE: loop exit
PB: predicated region body
PF: predicated region fallthrough
CT: control target
= control target key end

     0   :  { %s851_s11 = smov 0   ;;  %s853_s12 = smov 0   ;;  %s951_s0 = inlined_call_operand.vmem [shape: bf16[2,8,32], index: 0, kind: input, shape index: {}]   ;;  %s952_s1 = inlined_call_operand.vmem [shape: s32[2,8], index: 1, kind: input, shape index: {}]   ;;  %s953_s2 = inlined_call_operand.vmem [shape: f32[2,1], index: 2, kind: input, shape index: {}]   ;;  %s954_s3 = inlined_call_operand.vmem [shape: s32[2,1], index: 3, kind: input, shape index: {}]   ;;  %s955_s4 = inlined_call_operand.vmem [shape: s32[2,1], index: 4, kind: input, shape index: {}]   ;;  %s956_s5 = inlined_call_operand.vmem [shape: bf16[32,1], index: 5, kind: input, shape index: {}]   ;;  %s957_s6 = inlined_call_operand.<no memory space> [shape: f32[1], index: 6, kind: input, shape index: {}]   ;;  %s958_s7 = inlined_call_operand.vmem [shape: f32[2,1,1], index: 7, kind: output, shape index: {0}]   ;;  %s959_s8 = inlined_call_operand.vmem [shape: f32[2,1,1], index: 8, kind: output, shape index: {1}]   ;;  %s960_s9 = inlined_call_operand.vmem [shape: f32[2,1,1], index: 9, kind: output, shape index: {2}]  }
   0x1   :  { %15 = sst [smem:[#allocation2]] %s957_s6  ;;  %s855_s13 = smov 0  }
   0x2 LB: > { %s33_s6 = sadd.s32 1, %s789_s12  ;;  %p701_p0 = scmp.ge.s32.totalorder %s793_s13, 1  ;;  %s793_s13 = sphi %s855_s13, %s21_s13   ;;  %s789_s12 = sphi %s853_s12, %s964_s12   ;;  %s785_s11 = sphi %s851_s11, %s963_s11  }
   0x3   : > { %p35_p1 = scmp.ge.s32.totalorder %s33_s6, 2  ;;  %p337_p2 = scmp.lt.s32.totalorder %s793_s13, 3 }
   0x5   : > { %s966_s6 = smov (%p35_p1, %s33_s6), 0  ;;  %p338_p3 = pnand %p701_p0, %p337_p2 }
   0x6   : > { %p387_p4 = scmp.lt.s32.totalorder (!%p338_p3), %s785_s11, 0  ;;  %s723_s29 = sshll.u32 (!%p338_p3), %s785_s11, 3 }
   0x7   : > { %341 = sbr.rel (%p338_p3) target bundleno = 490 (0x1ea), region = 48  ;;  %s484_s16 = sld [smem:[#allocation2]] (!%p338_p3) }
   0x8   : > { %p406_p5 = scmp.lt.s32.totalorder (!%p338_p3), %s785_s11, 1 }
   0xc   : > { %v730_v0 = vld [vmem:[%s956_s5 + $0x8] sm:$0xff]  ;;  %v795_v1 = vmov 0   ;;  %v729_v2 = vld [vmem:[%s956_s5] sm:$0xff]  ;;  %s388_s18 = scalar_select %p387_p4, %s785_s11, 0  ;;  %vm448_vm0 = vcmask 261120   ;;  %v476_v10 = vlaneseq  ;;  %v488_v12 = vstv %s723_s29 }
   0xd   : > { %764 = vset.pattern.permute.xlu0 %v795_v1  ;;  %765 = vset.pattern.permute.xlu1 %v795_v1  ;;  %v503_v4 = vld [vmem:[%s953_s2] sm:$0x3]  ;;  %v796_v17 = vmov 0.0   ;;  %vm536_vm6 = vcmask 58368   ;;  %vm480_vm7 = vcmask 1041409   ;;  %v485_v26 = vstv %s484_s16  ;;  %s970_s11 = smov (!%p406_p5, %s785_s11), 1 }
   0xe   : > { %458 = vmatpush.bf16.msra.mxu0 %v730_v0  ;;  %766 = vset.pattern.permute.xlu2 %v795_v1  ;;  %s968_s18 = smov (!%p387_p4, %s388_s18), 0  ;;  %v490_v5 = vld [vmem:[%s954_s3] sm:$0x3]  ;;  %v477_v11 = vand.u32 127, %v476_v10  ;;  %vm797_vm11 = vmmov 1   ;;  %vm420_vm14 = vcmask 0   ;;  %s925_s25 = scalar_lea.vmem %s960_s9, %s970_s11 }
   0xf   : > { %s705_s19 = sshll.u32 %s968_s18, 2  ;;  %506 = vperm.xlu1 %765, %v503_v4   ;;  %v495_v6 = vld [vmem:[%s955_s4] sm:$0x3]  ;;  %s709_s30 = sshll.u32 %s968_s18, 1  ;;  %423 = vst.msk [vmem:[%s925_s25] sm:$0x1] %vm420_vm14, %v796_v17 }
  0x10   : > { %s392_s22 = scalar_lea.vmem %s951_s0, %s705_s19  ;;  %497 = vperm.xlu2 %766, %v495_v6   ;;  %v489_v13 = vadd.s32 %v488_v12, %v477_v11  ;;  %s402_s15 = scalar_lea.vmem %s952_s1, %s709_s30 }
  0x11   : > { %v728_v3 = vld [vmem:[%s392_s22] sm:$0xff]  ;;  %s915_s19 = scalar_lea.vmem %s958_s7, %s970_s11  ;;  %s920_s22 = scalar_lea.vmem %s959_s8, %s970_s11 }
  0x12   : > { %459 = vmatpush.bf16.msra.mxu0 %v729_v2  ;;  %vm501_vm3 = vcmp.lt.s32.totalorder %v489_v13, 8  ;;  %v466_v21 = vld [vmem:[%s402_s15] sm:$0x3]  ;;  %421 = vst.msk [vmem:[%s915_s19] sm:$0x1] %vm420_vm14, %v796_v17 }
  0x13   : > { %v467_v22 = vcvt.s32.f32 %v466_v21  ;;  %422 = vst.msk [vmem:[%s920_s22] sm:$0x1] %vm420_vm14, %v796_v17 }
  0x15   : > { %722 = vmatmul.msk.bf16.vlgmr.msra.gmra.mxu0 %vm448_vm0, %v728_v3 }
  0x17   : > { %492 = vperm.xlu1 %765, %v490_v5  }
  0x6a   : > { %v498_v14 = vpop.permute.xlu2 %497 }
  0x6b   : > { %vm499_vm1 = vcmp.lt.s32.totalorder %v489_v13, %v498_v14 }
  0x81   : > { %v507_v9 = vpop.permute.xlu1 %506 }
  0x82   : > { %vm527_vm8 = vcmp.ge.f32.partialorder %v507_v9, 0.5 }
  0x89   : > { %v493_v15 = vpop.permute.xlu1 %492 }
  0x8a   : > { %vm494_vm2 = vcmp.ge.s32.totalorder %v489_v13, %v493_v15 }
  0x8b   : > { %vm500_vm4 = vmand %vm494_vm2, %vm499_vm1 }
  0x8c   : > { %vm895_vm5 = vmand %vm500_vm4, %vm501_vm3 }
  0x8d   : > { %v725_v18 = vsel %vm895_vm5, 1.0, %v796_v17 }
  0x8e   : > { %v567_v19 = vsel %vm536_vm6, %v725_v18, 0.0 }
  0x8f   : > { %568 = vadd.xlane.f32.xlu1 %v567_v19 }
  0x92   : > { %v461_v7 = vpop.f32.mrf.mxu0 }
  0x93   : > { %471 = vperm.xlu0 %764, %v461_v7  }
  0x9a   : > { %v463_v8 = vpop.f32.mrf.mxu0 }
  0x9b   : > { %474 = vperm.xlu0 %764, %v463_v8   ;;  %v534_v8 = vld [vmem:[%s915_s19] sm:$0x1] }
 0x102   : > { %v569_v52 = vpop.xlane.xlu1 %568 }
 0x103   : > { %v570_v54 = vrot.slane %v569_v52, 4 }
 0x105   : > { %v472_v20 = vpop.permute.xlu0 %471  ;;  %v571_v56 = vadd.f32 %v570_v54, %v569_v52 }
 0x106   : > { %v478_v24 = vperm.slane %v472_v20, %v477_v11 }
 0x107   : > { %v572_v59 = vrot.slane %v571_v56, 2 }
 0x109   : > { %v573_v63 = vadd.f32 %v572_v59, %v571_v56 }
 0x10b   : > { %v574_v4 = vrot.slane %v573_v63, 1 }
 0x10d   : > { %v475_v23 = vpop.permute.xlu0 %474  ;;  %v575_v7 = vadd.f32 %v574_v4, %v573_v63 }
 0x10e   : > { %v479_v25 = vperm.slane %v475_v23, %v477_v11  ;;  %v566_v11 = vld [vmem:[%s925_s25] sm:$0x1] }
 0x110   : > { %v481_v27 = vsel %vm480_vm7, %v479_v25, %v478_v24 }
 0x111   : > { %v483_v28 = vmul.f32 %v481_v27, %v467_v22 }
 0x113   : > { %v486_v29 = vadd.f32 %v485_v26, %v483_v28 }
 0x115   : > { %v512_v30 = vand.u32 2147483647, %v486_v29  ;;  %vm526_vm9 = vcmp.ge.f32.partialorder %v486_v29, 0.5  ;;  %v509_v40 = vmax.f32 %v486_v29, 0.0  ;;  %v510_v41 = vmul.f32 %v507_v9, %v486_v29  ;;  %v551_v9 = vld [vmem:[%s920_s22] sm:$0x1] }
 0x116   : > { %vm528_vm10 = vmxor %vm526_vm9, %vm527_vm8 }
 0x117   : > { %v513_v31 = vsub.f32 0.0, %v512_v30  ;;  %vm529_vm12 = vmxor %vm528_vm10, %vm797_vm11  ;;  %v511_v46 = vsub.f32 %v509_v40, %v510_v41 }
 0x118   : > { %v724_v32 = vsel %vm529_vm12, 1.0, %v796_v17 }
 0x119   : > { %v514_v33 = vmul.f32 1.442695, %v513_v31  ;;  %v552_v34 = vmul.f32 %v725_v18, %v724_v32 }
 0x11b   : > { %767 = vpow2.f32 %v514_v33  ;;  %v553_v35 = vsel %vm536_vm6, %v552_v34, 0.0 }
 0x11c   : > { %554 = vadd.xlane.f32.xlu0 %v553_v35 }
 0x121   : > { %v768_v36 = vpop.eup %767 }
 0x122   : > { %v516_v37 = vadd.f32 1.0, %v768_v36  ;;  %v519_v38 = vmul.f32 -0.5, %v768_v36  ;;  %v522_v42 = vand.u32 2147483647, %v768_v36 }
 0x124   : > { %769 = vlog2.f32 %v516_v37  ;;  %v520_v39 = vadd.f32 1.0, %v519_v38  ;;  %vm523_vm13 = vcmp.lt.f32.partialorder %v522_v42, 0.0004427343 }
 0x126   : > { %v521_v45 = vmul.f32 %v768_v36, %v520_v39 }
 0x12a   : > { %v770_v43 = vpop.eup %769 }
 0x12b   : > { %v518_v44 = vmul.f32 0.6931472, %v770_v43 }
 0x12d   : > { %v524_v47 = vsel %vm523_vm13, %v521_v45, %v518_v44 }
 0x12e   : > { %v525_v48 = vadd.f32 %v524_v47, %v511_v46 }
 0x130   : > { %v535_v49 = vsel %vm895_vm5, %v525_v48, 0.0 }
 0x131   : > { %v537_v50 = vsel %vm536_vm6, %v535_v49, 0.0 }
 0x132   : > { %538 = vadd.xlane.f32.xlu2 %v537_v50 }
 0x18f   : > { %v555_v51 = vpop.xlane.xlu0 %554 }
 0x190   : > { %v556_v53 = vrot.slane %v555_v51, 4 }
 0x192   : > { %v557_v55 = vadd.f32 %v556_v53, %v555_v51 }
 0x194   : > { %v558_v57 = vrot.slane %v557_v55, 2 }
 0x196   : > { %v559_v62 = vadd.f32 %v558_v57, %v557_v55 }
 0x198   : > { %v560_v2 = vrot.slane %v559_v62, 1 }
 0x19a   : > { %v561_v6 = vadd.f32 %v560_v2, %v559_v62 }
 0x1a5   : > { %v539_v58 = vpop.xlane.xlu2 %538 }
 0x1a6   : > { %v540_v60 = vrot.slane %v539_v58, 4 }
 0x1a8   : > { %v541_v61 = vadd.f32 %v540_v60, %v539_v58 }
 0x1aa   : > { %v542_v0 = vrot.slane %v541_v61, 2 }
 0x1ac   : > { %v543_v1 = vadd.f32 %v542_v0, %v541_v61 }
 0x1ae   : > { %v544_v3 = vrot.slane %v543_v1, 1 }
 0x1b0   : > { %v545_v5 = vadd.f32 %v544_v3, %v543_v1 }
 0x1b2   : > { %731 = vpush %v545_v5 }
 0x1b3   : > { %733 = vpush %v561_v6 }
 0x1b4   : > { %735 = vpush %v575_v7 }
 0x1e3   : > { %s732_s11 = spop %731 }
 0x1e4   : > { %v547_v10 = vstv %s732_s11  ;;  %s734_s26 = spop %733 }
 0x1e5   : > { %v548_v12 = vadd.f32 %v547_v10, %v534_v8  ;;  %v563_v13 = vstv %s734_s26  ;;  %s736_s27 = spop %735 }
 0x1e6   : > { %v564_v14 = vadd.f32 %v563_v13, %v551_v9  ;;  %v577_v15 = vstv %s736_s27 }
 0x1e7   : > { %550 = vst.msk [vmem:[%s915_s19] sm:$0x1] %vm420_vm14, %v548_v12  ;;  %v578_v16 = vadd.f32 %v577_v15, %v566_v11 }
 0x1e8   : > { %565 = vst.msk [vmem:[%s920_s22] sm:$0x1] %vm420_vm14, %v564_v14 }
 0x1e9   : > { %579 = vst.msk [vmem:[%s925_s25] sm:$0x1] %vm420_vm14, %v578_v16 }
 0x1ea PF: > { %s21_s13 = sadd.s32 1, %s793_s13   ;;  %s963_s11 = smov %s789_s12 }
 0x1eb   : > { %p18_p6 = scmp.ge.s32.totalorder %s21_s13, 4   ;;  %s964_s12 = smov %s966_s6 }
 0x1ed   :  { %20 = sbr.rel (!%p18_p6) target bundleno = 2 (0x2), region = 109 }

</bundles_post_ra>
